<compile_context>
chip_gen: v5e
topology: v5e:2x2
jax: 0.10.0
libtpu: 0.0.40
codegen_flags: <defaults>
</compile_context>

<pallas_src>
import functools

import jax
import jax.numpy as jnp
from jax import lax
from jax.experimental import pallas as pl
from jax.experimental.pallas import tpu as pltpu


# --------------------------------------------------------------------------
# Fused kernel: conv3x3+ReLU -> conv3x3+ReLU -> BatchNorm(train) -> deconv2x2 s2
# Lane-packed layout: activations (rows = N*H, lanes = W*C).
# --------------------------------------------------------------------------
def _fused_decoder_kernel(x_ref, rhs1_ref, b1_ref, rhs2_ref, b2_ref,
                          g_ref, be_ref, gsum_ref, rhsd_ref, bd_ref, o_ref,
                          *, H, W, bn_flag, eps):
    # x_ref   : (R, W*Cin)            lane-packed input,  R = N*H
    # rhs1_ref: (3, W*Cin,  W*Cout)   banded conv1 weights (dh on the first axis)
    # rhs2_ref: (3, W*Cout, W*Cout)   banded conv2 weights
    # b1/b2/g/be_ref : (1, W*Cout)    per-channel params tiled across w groups
    # gsum_ref: (W*Cout, W*Cout)      tiled identity: sums over w groups per channel
    # rhsd_ref: (W*Cout, W*4*C2)      block-diagonal deconv weights (lane-dense out)
    # bd_ref  : (1, W*4*C2)
    # o_ref   : (R, W*4*C2)           lane-dense packed output (w, i, j, co)
    R = x_ref.shape[0]

    # Row-validity masks for the h-1 / h+1 taps: the sublane roll wraps across
    # image (and sample) boundaries, so zero each image's top / bottom edge row.
    h_idx = lax.broadcasted_iota(jnp.int32, (R, 1), 0) % H
    top_ok = h_idx != 0          # row h-1 exists
    bot_ok = h_idx != H - 1      # row h+1 exists

    def conv3x3_relu(a, rhs_ref, b_ref):
        # a: (R, W*Ci) lane-packed activation.  The dw taps and zero-padding
        # along w live inside the banded RHS, so the conv is 3 full-width
        # matmuls; the dh taps are two XLU sublane rolls + a VPU mask.
        up = jnp.where(top_ok, pltpu.roll(a, 1, 0), 0.0)        # holds row h-1
        dn = jnp.where(bot_ok, pltpu.roll(a, R - 1, 0), 0.0)    # holds row h+1
        acc = jnp.dot(up, rhs_ref[0], preferred_element_type=jnp.float32)
        acc = acc + jnp.dot(a, rhs_ref[1], preferred_element_type=jnp.float32)
        acc = acc + jnp.dot(dn, rhs_ref[2], preferred_element_type=jnp.float32)
        return jnp.maximum(acc + b_ref[...], 0.0)

    y1 = conv3x3_relu(x_ref[...], rhs1_ref, b1_ref)     # (R, W*Cout)
    y2 = conv3x3_relu(y1, rhs2_ref, b2_ref)              # (R, W*Cout)

    # ---------------- BatchNorm2d (training batch stats, biased var) ---------
    if bn_flag:
        inv_m = 1.0 / (R * W)                             # M = N*H*W elems / channel
        s1 = jnp.sum(y2, axis=0, keepdims=True)           # (1, W*Cout) per-(w,c) sums
        # gsum sums the W lane groups per channel AND re-broadcasts the result
        # back to every (w, c) lane in one tiny MXU pass (no lane->sublane reshape).
        mean_t = jnp.dot(s1, gsum_ref[...],
                         preferred_element_type=jnp.float32) * inv_m
        yc = y2 - mean_t
        s2 = jnp.sum(yc * yc, axis=0, keepdims=True)
        var_t = jnp.dot(s2, gsum_ref[...],
                        preferred_element_type=jnp.float32) * inv_m
        y2 = yc * lax.rsqrt(var_t + eps) * g_ref[...] + be_ref[...]

    # ---------------- ConvTranspose2d k=2 s=2: one block-diagonal matmul -----
    # Emits the packed (w, i, j, co) layout directly -> single 256-lane store.
    o_ref[...] = (jnp.dot(y2, rhsd_ref[...], preferred_element_type=jnp.float32)
                  + bd_ref[...])


# --------------------------------------------------------------------------
# Full DecoderLayer forward (NCHW in / NCHW out, like the PyTorch module).
# --------------------------------------------------------------------------
def decoder_layer_forward(x_nchw, params, skip_data=None, batch_norm_flag=True):
    if skip_data is not None:
        x_nchw = jnp.concatenate([x_nchw, skip_data], axis=1)

    N, Cin, H, W = x_nchw.shape
    f32 = jnp.float32
    x = jnp.transpose(x_nchw, (0, 2, 3, 1)).astype(f32)     # NCHW -> NHWC
    x_pk = x.reshape(N * H, W * Cin)                         # lane-dense (R, W*Cin)

    w1, b1 = params["w1"], params["b1"]          # HWIO (3,3,Cin,Cout)
    w2, b2 = params["w2"], params["b2"]          # HWIO (3,3,Cout,Cout)
    wd, bd = params["wd"], params["bd"]          # torch (Cout, C2, 2, 2), (C2,)
    Cout = w1.shape[-1]
    C2 = wd.shape[1]
    K = 4 * C2
    R = N * H

    # ---------------- one-time host-side weight prepacking -------------------
    def banded_rhs(w_hwio, Ci, Co):
        # rhs[dh, wi*Ci+ci, wo*Co+co] = w[dh, wi-wo+1, ci, co] (0 outside band);
        # zero-padding along w is implicit in the missing band entries.
        wi = jnp.arange(W)
        wo = jnp.arange(W)
        dw = jnp.arange(3)
        sel = (wi[None, :, None] == wo[None, None, :] + dw[:, None, None] - 1)
        rhs = jnp.einsum("kiw,hkco->hicwo", sel.astype(f32), w_hwio.astype(f32))
        return rhs.reshape(3, W * Ci, W * Co)

    rhs1 = banded_rhs(w1, Cin, Cout)                              # (3, W*Cin,  W*Cout)
    rhs2 = banded_rhs(w2, Cout, Cout)                             # (3, W*Cout, W*Cout)
    b1_t = jnp.tile(b1.astype(f32), W).reshape(1, W * Cout)
    b2_t = jnp.tile(b2.astype(f32), W).reshape(1, W * Cout)
    g_t = jnp.tile(params["gamma"].astype(f32), W).reshape(1, W * Cout)
    be_t = jnp.tile(params["beta"].astype(f32), W).reshape(1, W * Cout)
    gsum = jnp.tile(jnp.eye(Cout, dtype=f32), (W, W))             # (W*Cout, W*Cout)

    wd_tap = jnp.transpose(wd.astype(f32), (0, 2, 3, 1)).reshape(Cout, K)  # (c,(i,j,co))
    rhsd = jnp.einsum("wv,ck->wcvk", jnp.eye(W, dtype=f32), wd_tap)
    rhsd = rhsd.reshape(W * Cout, W * K)                          # block-diagonal
    bd_t = jnp.tile(bd.astype(f32), 4 * W).reshape(1, W * K)

    kernel = functools.partial(_fused_decoder_kernel, H=H, W=W,
                               bn_flag=bool(batch_norm_flag), eps=1e-5)

    flops = 2 * R * (3 * (W * Cin) * (W * Cout)
                     + 3 * (W * Cout) * (W * Cout)
                     + (W * Cout) * (W * K)) + 4 * (W * Cout) * (W * Cout)
    bytes_accessed = 4 * (R * W * Cin + rhs1.size + rhs2.size + rhsd.size
                          + gsum.size + 6 * W * Cout + W * K + R * W * K)

    def full(shape):
        return pl.BlockSpec(shape, lambda i: (0,) * len(shape))

    y = pl.pallas_call(
        kernel,
        out_shape=jax.ShapeDtypeStruct((R, W * K), f32),
        grid=(1,),
        in_specs=[
            full((R, W * Cin)),
            full((3, W * Cin, W * Cout)),
            full((1, W * Cout)),
            full((3, W * Cout, W * Cout)),
            full((1, W * Cout)),
            full((1, W * Cout)),
            full((1, W * Cout)),
            full((W * Cout, W * Cout)),
            full((W * Cout, W * K)),
            full((1, W * K)),
        ],
        out_specs=full((R, W * K)),
        compiler_params=pltpu.CompilerParams(
            dimension_semantics=("arbitrary",),
            vmem_limit_bytes=64 * 1024 * 1024),
        cost_estimate=pl.CostEstimate(flops=flops, transcendentals=W * Cout,
                                      bytes_accessed=bytes_accessed),
    )(x_pk, rhs1, b1_t, rhs2, b2_t, g_t, be_t, gsum, rhsd, bd_t)

    # single boundary transform: packed lanes (w, i, j, co) -> NCHW (N,C2,2H,2W)
    y = y.reshape(N, H, W, 2, 2, C2)
    y = jnp.transpose(y, (0, 5, 1, 3, 2, 4)).reshape(N, C2, 2 * H, 2 * W)
    return y


# --------------------------------------------------------------------------
# Pure-JAX reference (same math, independent code path) for validation.
# --------------------------------------------------------------------------
def decoder_layer_reference(x_nchw, params, batch_norm_flag=True, eps=1e-5):
    x = jnp.transpose(x_nchw, (0, 2, 3, 1))
    dn = ("NHWC", "HWIO", "NHWC")
    x = jax.nn.relu(lax.conv_general_dilated(
        x, params["w1"], (1, 1), "SAME", dimension_numbers=dn) + params["b1"])
    x = jax.nn.relu(lax.conv_general_dilated(
        x, params["w2"], (1, 1), "SAME", dimension_numbers=dn) + params["b2"])
    if batch_norm_flag:
        mean = jnp.mean(x, axis=(0, 1, 2), keepdims=True)
        var = jnp.mean((x - mean) ** 2, axis=(0, 1, 2), keepdims=True)
        x = (x - mean) / jnp.sqrt(var + eps) * params["gamma"] + params["beta"]
    # ConvTranspose2d k=2 s=2 p=0: out[n,2h+i,2w+j,o] = sum_c x[n,h,w,c]*wd[c,o,i,j]+bd[o]
    y = jnp.einsum("nhwc,coij->nhiwjo", x, params["wd"])
    Nn, Hh, _, Ww, _, C2 = y.shape
    y = y.reshape(Nn, 2 * Hh, 2 * Ww, C2) + params["bd"]
    return jnp.transpose(y, (0, 3, 1, 2))


if __name__ == "__main__":
    key = jax.random.PRNGKey(0)
    ks = jax.random.split(key, 9)

    N, Cin, H, W = 2, 4, 16, 16
    Cout = 8
    C2 = Cout // 2

    params = {
        "w1": 0.1 * jax.random.normal(ks[0], (3, 3, Cin, Cout), jnp.float32),   # HWIO
        "b1": 0.1 * jax.random.normal(ks[1], (Cout,), jnp.float32),
        "w2": 0.1 * jax.random.normal(ks[2], (3, 3, Cout, Cout), jnp.float32),  # HWIO
        "b2": 0.1 * jax.random.normal(ks[3], (Cout,), jnp.float32),
        "gamma": 1.0 + 0.1 * jax.random.normal(ks[4], (Cout,), jnp.float32),
        "beta": 0.1 * jax.random.normal(ks[5], (Cout,), jnp.float32),
        "wd": 0.1 * jax.random.normal(ks[6], (Cout, C2, 2, 2), jnp.float32),    # torch (Cin,Cout,kh,kw)
        "bd": 0.1 * jax.random.normal(ks[7], (C2,), jnp.float32),
    }
    x = jax.random.normal(ks[8], (N, Cin, H, W), jnp.float32)     # NCHW like PyTorch

    for bn in (True, False):
        out = decoder_layer_forward(x, params, skip_data=None, batch_norm_flag=bn)
        out = jax.block_until_ready(out)
        ref = decoder_layer_reference(x, params, batch_norm_flag=bn)
        ref = jax.block_until_ready(ref)
        assert out.shape == (N, C2, 2 * H, 2 * W), out.shape
        assert jnp.allclose(out, ref, rtol=1e-4, atol=1e-4), (
            "bn=%s max abs err = %e" % (bn, float(jnp.max(jnp.abs(out - ref)))))

    print("KERNEL_OK")
</pallas_src>

<mosaic_0001>
module attributes {stable_mosaic.version = 11 : i64} {
  func.func @_fused_decoder_kernel(%arg0: i32, %arg1: memref<32x64xf32, #tpu.memory_space<vmem>>, %arg2: memref<3x64x128xf32, #tpu.memory_space<vmem>>, %arg3: memref<1x128xf32, #tpu.memory_space<vmem>>, %arg4: memref<3x128x128xf32, #tpu.memory_space<vmem>>, %arg5: memref<1x128xf32, #tpu.memory_space<vmem>>, %arg6: memref<1x128xf32, #tpu.memory_space<vmem>>, %arg7: memref<1x128xf32, #tpu.memory_space<vmem>>, %arg8: memref<128x128xf32, #tpu.memory_space<vmem>>, %arg9: memref<128x256xf32, #tpu.memory_space<vmem>>, %arg10: memref<1x256xf32, #tpu.memory_space<vmem>>, %arg11: memref<32x256xf32, #tpu.memory_space<vmem>>) attributes {dimension_semantics = [#tpu.dimension_semantics<arbitrary>], iteration_bounds = array<i64: 1>, scalar_prefetch = 0 : i64, scratch_operands = 0 : i64, tpu.core_type = #tpu.core_type<tc>, window_params = [{pipeline_mode = #tpu.pipeline_mode<synchronous>, transform_indices = @transform_0, window_bounds = array<i64: 32, 64>}, {pipeline_mode = #tpu.pipeline_mode<synchronous>, transform_indices = @transform_1, window_bounds = array<i64: 3, 64, 128>}, {pipeline_mode = #tpu.pipeline_mode<synchronous>, transform_indices = @transform_2, window_bounds = array<i64: 1, 128>}, {pipeline_mode = #tpu.pipeline_mode<synchronous>, transform_indices = @transform_3, window_bounds = array<i64: 3, 128, 128>}, {pipeline_mode = #tpu.pipeline_mode<synchronous>, transform_indices = @transform_4, window_bounds = array<i64: 1, 128>}, {pipeline_mode = #tpu.pipeline_mode<synchronous>, transform_indices = @transform_5, window_bounds = array<i64: 1, 128>}, {pipeline_mode = #tpu.pipeline_mode<synchronous>, transform_indices = @transform_6, window_bounds = array<i64: 1, 128>}, {pipeline_mode = #tpu.pipeline_mode<synchronous>, transform_indices = @transform_7, window_bounds = array<i64: 128, 128>}, {pipeline_mode = #tpu.pipeline_mode<synchronous>, transform_indices = @transform_8, window_bounds = array<i64: 128, 256>}, {pipeline_mode = #tpu.pipeline_mode<synchronous>, transform_indices = @transform_9, window_bounds = array<i64: 1, 256>}, {pipeline_mode = #tpu.pipeline_mode<synchronous>, transform_indices = @transform_10, window_bounds = array<i64: 32, 256>}]} {
    %0 = tpu.iota {dimensions = array<i32: 0>} : vector<32x1xi32>
    %c16_i32 = arith.constant 16 : i32
    %c0_i32 = arith.constant 0 : i32
    %1 = arith.cmpi eq, %c16_i32, %c0_i32 : i32
    %c1_i32 = arith.constant 1 : i32
    %2 = arith.select %1, %c1_i32, %c16_i32 : i32
    %3 = vector.broadcast %2 : i32 to vector<32x1xi32>
    %4 = arith.remsi %0, %3 : vector<32x1xi32>
    %c0_i32_0 = arith.constant 0 : i32
    %5 = vector.broadcast %c0_i32_0 : i32 to vector<32x1xi32>
    %6 = arith.cmpi ne, %4, %5 : vector<32x1xi32>
    %c0_i32_1 = arith.constant 0 : i32
    %7 = vector.broadcast %c0_i32_1 : i32 to vector<32x1xi32>
    %8 = arith.cmpi slt, %4, %7 : vector<32x1xi32>
    %c0_i32_2 = arith.constant 0 : i32
    %9 = arith.cmpi slt, %2, %c0_i32_2 : i32
    %10 = vector.broadcast %9 : i1 to vector<32x1xi1>
    %11 = vector.broadcast %10 : vector<32x1xi1> to vector<32x1xi1>
    %12 = arith.xori %8, %11 : vector<32x1xi1>
    %13 = arith.andi %12, %6 : vector<32x1xi1>
    %14 = vector.broadcast %2 : i32 to vector<32x1xi32>
    %15 = arith.addi %4, %14 : vector<32x1xi32>
    %16 = arith.select %13, %15, %4 : vector<32x1xi1>, vector<32x1xi32>
    %c0_i32_3 = arith.constant 0 : i32
    %17 = vector.broadcast %c0_i32_3 : i32 to vector<32x1xi32>
    %18 = arith.cmpi ne, %16, %17 : vector<32x1xi32>
    %c15_i32 = arith.constant 15 : i32
    %19 = vector.broadcast %c15_i32 : i32 to vector<32x1xi32>
    %20 = arith.cmpi ne, %16, %19 : vector<32x1xi32>
    %c0 = arith.constant 0 : index
    %c0_4 = arith.constant 0 : index
    %21 = vector.load %arg1[%c0, %c0_4] : memref<32x64xf32, #tpu.memory_space<vmem>>, vector<32x64xf32>
    %c1_i32_5 = arith.constant 1 : i32
    %22 = tpu.dynamic_rotate %21 by %c1_i32_5 dim 0 : vector<32x64xf32>, i32 -> vector<32x64xf32>
    %cst = arith.constant 0.000000e+00 : f32
    %23 = vector.shape_cast %18 : vector<32x1xi1> to vector<32x1xi1>
    %24 = vector.broadcast %23 : vector<32x1xi1> to vector<32x64xi1>
    %25 = vector.broadcast %cst : f32 to vector<32x64xf32>
    %26 = arith.select %24, %22, %25 : vector<32x64xi1>, vector<32x64xf32>
    %c31_i32 = arith.constant 31 : i32
    %27 = tpu.dynamic_rotate %21 by %c31_i32 dim 0 : vector<32x64xf32>, i32 -> vector<32x64xf32>
    %cst_6 = arith.constant 0.000000e+00 : f32
    %28 = vector.shape_cast %20 : vector<32x1xi1> to vector<32x1xi1>
    %29 = vector.broadcast %28 : vector<32x1xi1> to vector<32x64xi1>
    %30 = vector.broadcast %cst_6 : f32 to vector<32x64xf32>
    %31 = arith.select %29, %27, %30 : vector<32x64xi1>, vector<32x64xf32>
    %c0_7 = arith.constant 0 : index
    %c0_8 = arith.constant 0 : index
    %c0_9 = arith.constant 0 : index
    %32 = vector.load %arg2[%c0_7, %c0_8, %c0_9] : memref<3x64x128xf32, #tpu.memory_space<vmem>>, vector<1x64x128xf32>
    %33 = vector.shape_cast %32 : vector<1x64x128xf32> to vector<64x128xf32>
    %cst_10 = arith.constant dense<0.000000e+00> : vector<32x128xf32>
    %34 = tpu.matmul %26, %33, %cst_10 {dimension_numbers = #tpu.dot_dimension_numbers<[1], [0], [0], [1], [0, 0, 1, 1], [], []>} : vector<32x64xf32>, vector<64x128xf32>, vector<32x128xf32> -> vector<32x128xf32>
    %c1 = arith.constant 1 : index
    %c0_11 = arith.constant 0 : index
    %c0_12 = arith.constant 0 : index
    %35 = vector.load %arg2[%c1, %c0_11, %c0_12] : memref<3x64x128xf32, #tpu.memory_space<vmem>>, vector<1x64x128xf32>
    %36 = vector.shape_cast %35 : vector<1x64x128xf32> to vector<64x128xf32>
    %cst_13 = arith.constant dense<0.000000e+00> : vector<32x128xf32>
    %37 = tpu.matmul %21, %36, %cst_13 {dimension_numbers = #tpu.dot_dimension_numbers<[1], [0], [0], [1], [0, 0, 1, 1], [], []>} : vector<32x64xf32>, vector<64x128xf32>, vector<32x128xf32> -> vector<32x128xf32>
    %38 = arith.addf %34, %37 : vector<32x128xf32>
    %c2 = arith.constant 2 : index
    %c0_14 = arith.constant 0 : index
    %c0_15 = arith.constant 0 : index
    %39 = vector.load %arg2[%c2, %c0_14, %c0_15] : memref<3x64x128xf32, #tpu.memory_space<vmem>>, vector<1x64x128xf32>
    %40 = vector.shape_cast %39 : vector<1x64x128xf32> to vector<64x128xf32>
    %cst_16 = arith.constant dense<0.000000e+00> : vector<32x128xf32>
    %41 = tpu.matmul %31, %40, %cst_16 {dimension_numbers = #tpu.dot_dimension_numbers<[1], [0], [0], [1], [0, 0, 1, 1], [], []>} : vector<32x64xf32>, vector<64x128xf32>, vector<32x128xf32> -> vector<32x128xf32>
    %42 = arith.addf %38, %41 : vector<32x128xf32>
    %c0_17 = arith.constant 0 : index
    %c0_18 = arith.constant 0 : index
    %43 = vector.load %arg3[%c0_17, %c0_18] : memref<1x128xf32, #tpu.memory_space<vmem>>, vector<1x128xf32>
    %44 = vector.broadcast %43 : vector<1x128xf32> to vector<32x128xf32>
    %45 = arith.addf %42, %44 : vector<32x128xf32>
    %cst_19 = arith.constant 0.000000e+00 : f32
    %46 = vector.broadcast %cst_19 : f32 to vector<32x128xf32>
    %47 = arith.maximumf %45, %46 : vector<32x128xf32>
    %c1_i32_20 = arith.constant 1 : i32
    %48 = tpu.dynamic_rotate %47 by %c1_i32_20 dim 0 : vector<32x128xf32>, i32 -> vector<32x128xf32>
    %cst_21 = arith.constant 0.000000e+00 : f32
    %49 = vector.shape_cast %18 : vector<32x1xi1> to vector<32x1xi1>
    %50 = vector.broadcast %49 : vector<32x1xi1> to vector<32x128xi1>
    %51 = vector.broadcast %cst_21 : f32 to vector<32x128xf32>
    %52 = arith.select %50, %48, %51 : vector<32x128xi1>, vector<32x128xf32>
    %c31_i32_22 = arith.constant 31 : i32
    %53 = tpu.dynamic_rotate %47 by %c31_i32_22 dim 0 : vector<32x128xf32>, i32 -> vector<32x128xf32>
    %cst_23 = arith.constant 0.000000e+00 : f32
    %54 = vector.shape_cast %20 : vector<32x1xi1> to vector<32x1xi1>
    %55 = vector.broadcast %54 : vector<32x1xi1> to vector<32x128xi1>
    %56 = vector.broadcast %cst_23 : f32 to vector<32x128xf32>
    %57 = arith.select %55, %53, %56 : vector<32x128xi1>, vector<32x128xf32>
    %c0_24 = arith.constant 0 : index
    %c0_25 = arith.constant 0 : index
    %c0_26 = arith.constant 0 : index
    %58 = vector.load %arg4[%c0_24, %c0_25, %c0_26] : memref<3x128x128xf32, #tpu.memory_space<vmem>>, vector<1x128x128xf32>
    %59 = vector.shape_cast %58 : vector<1x128x128xf32> to vector<128x128xf32>
    %cst_27 = arith.constant dense<0.000000e+00> : vector<32x128xf32>
    %60 = tpu.matmul %52, %59, %cst_27 {dimension_numbers = #tpu.dot_dimension_numbers<[1], [0], [0], [1], [0, 0, 1, 1], [], []>} : vector<32x128xf32>, vector<128x128xf32>, vector<32x128xf32> -> vector<32x128xf32>
    %c1_28 = arith.constant 1 : index
    %c0_29 = arith.constant 0 : index
    %c0_30 = arith.constant 0 : index
    %61 = vector.load %arg4[%c1_28, %c0_29, %c0_30] : memref<3x128x128xf32, #tpu.memory_space<vmem>>, vector<1x128x128xf32>
    %62 = vector.shape_cast %61 : vector<1x128x128xf32> to vector<128x128xf32>
    %cst_31 = arith.constant dense<0.000000e+00> : vector<32x128xf32>
    %63 = tpu.matmul %47, %62, %cst_31 {dimension_numbers = #tpu.dot_dimension_numbers<[1], [0], [0], [1], [0, 0, 1, 1], [], []>} : vector<32x128xf32>, vector<128x128xf32>, vector<32x128xf32> -> vector<32x128xf32>
    %64 = arith.addf %60, %63 : vector<32x128xf32>
    %c2_32 = arith.constant 2 : index
    %c0_33 = arith.constant 0 : index
    %c0_34 = arith.constant 0 : index
    %65 = vector.load %arg4[%c2_32, %c0_33, %c0_34] : memref<3x128x128xf32, #tpu.memory_space<vmem>>, vector<1x128x128xf32>
    %66 = vector.shape_cast %65 : vector<1x128x128xf32> to vector<128x128xf32>
    %cst_35 = arith.constant dense<0.000000e+00> : vector<32x128xf32>
    %67 = tpu.matmul %57, %66, %cst_35 {dimension_numbers = #tpu.dot_dimension_numbers<[1], [0], [0], [1], [0, 0, 1, 1], [], []>} : vector<32x128xf32>, vector<128x128xf32>, vector<32x128xf32> -> vector<32x128xf32>
    %68 = arith.addf %64, %67 : vector<32x128xf32>
    %c0_36 = arith.constant 0 : index
    %c0_37 = arith.constant 0 : index
    %69 = vector.load %arg5[%c0_36, %c0_37] : memref<1x128xf32, #tpu.memory_space<vmem>>, vector<1x128xf32>
    %70 = vector.broadcast %69 : vector<1x128xf32> to vector<32x128xf32>
    %71 = arith.addf %68, %70 : vector<32x128xf32>
    %cst_38 = arith.constant 0.000000e+00 : f32
    %72 = vector.broadcast %cst_38 : f32 to vector<32x128xf32>
    %73 = arith.maximumf %71, %72 : vector<32x128xf32>
    %cst_39 = arith.constant dense<0.000000e+00> : vector<128xf32>
    %74 = vector.multi_reduction <add>, %73, %cst_39 [0] : vector<32x128xf32> to vector<128xf32>
    %75 = vector.shape_cast %74 : vector<128xf32> to vector<1x128xf32>
    %c0_40 = arith.constant 0 : index
    %c0_41 = arith.constant 0 : index
    %76 = vector.load %arg8[%c0_40, %c0_41] : memref<128x128xf32, #tpu.memory_space<vmem>>, vector<128x128xf32>
    %cst_42 = arith.constant dense<0.000000e+00> : vector<1x128xf32>
    %77 = tpu.matmul %75, %76, %cst_42 {dimension_numbers = #tpu.dot_dimension_numbers<[1], [0], [0], [1], [0, 0, 1, 1], [], []>} : vector<1x128xf32>, vector<128x128xf32>, vector<1x128xf32> -> vector<1x128xf32>
    %cst_43 = arith.constant 0.001953125 : f32
    %78 = vector.broadcast %cst_43 : f32 to vector<1x128xf32>
    %79 = arith.mulf %77, %78 : vector<1x128xf32>
    %80 = vector.broadcast %79 : vector<1x128xf32> to vector<32x128xf32>
    %81 = arith.subf %73, %80 : vector<32x128xf32>
    %82 = arith.mulf %81, %81 : vector<32x128xf32>
    %cst_44 = arith.constant dense<0.000000e+00> : vector<128xf32>
    %83 = vector.multi_reduction <add>, %82, %cst_44 [0] : vector<32x128xf32> to vector<128xf32>
    %84 = vector.shape_cast %83 : vector<128xf32> to vector<1x128xf32>
    %c0_45 = arith.constant 0 : index
    %c0_46 = arith.constant 0 : index
    %85 = vector.load %arg8[%c0_45, %c0_46] : memref<128x128xf32, #tpu.memory_space<vmem>>, vector<128x128xf32>
    %cst_47 = arith.constant dense<0.000000e+00> : vector<1x128xf32>
    %86 = tpu.matmul %84, %85, %cst_47 {dimension_numbers = #tpu.dot_dimension_numbers<[1], [0], [0], [1], [0, 0, 1, 1], [], []>} : vector<1x128xf32>, vector<128x128xf32>, vector<1x128xf32> -> vector<1x128xf32>
    %cst_48 = arith.constant 0.001953125 : f32
    %87 = vector.broadcast %cst_48 : f32 to vector<1x128xf32>
    %88 = arith.mulf %86, %87 : vector<1x128xf32>
    %cst_49 = arith.constant 9.99999974E-6 : f32
    %89 = vector.broadcast %cst_49 : f32 to vector<1x128xf32>
    %90 = arith.addf %88, %89 : vector<1x128xf32>
    %91 = math.rsqrt %90 : vector<1x128xf32>
    %92 = vector.broadcast %91 : vector<1x128xf32> to vector<32x128xf32>
    %93 = arith.mulf %81, %92 : vector<32x128xf32>
    %c0_50 = arith.constant 0 : index
    %c0_51 = arith.constant 0 : index
    %94 = vector.load %arg6[%c0_50, %c0_51] : memref<1x128xf32, #tpu.memory_space<vmem>>, vector<1x128xf32>
    %95 = vector.broadcast %94 : vector<1x128xf32> to vector<32x128xf32>
    %96 = arith.mulf %93, %95 : vector<32x128xf32>
    %c0_52 = arith.constant 0 : index
    %c0_53 = arith.constant 0 : index
    %97 = vector.load %arg7[%c0_52, %c0_53] : memref<1x128xf32, #tpu.memory_space<vmem>>, vector<1x128xf32>
    %98 = vector.broadcast %97 : vector<1x128xf32> to vector<32x128xf32>
    %99 = arith.addf %96, %98 : vector<32x128xf32>
    %c0_54 = arith.constant 0 : index
    %c0_55 = arith.constant 0 : index
    %100 = vector.load %arg9[%c0_54, %c0_55] : memref<128x256xf32, #tpu.memory_space<vmem>>, vector<128x256xf32>
    %cst_56 = arith.constant dense<0.000000e+00> : vector<32x256xf32>
    %101 = tpu.matmul %99, %100, %cst_56 {dimension_numbers = #tpu.dot_dimension_numbers<[1], [0], [0], [1], [0, 0, 1, 1], [], []>} : vector<32x128xf32>, vector<128x256xf32>, vector<32x256xf32> -> vector<32x256xf32>
    %c0_57 = arith.constant 0 : index
    %c0_58 = arith.constant 0 : index
    %102 = vector.load %arg10[%c0_57, %c0_58] : memref<1x256xf32, #tpu.memory_space<vmem>>, vector<1x256xf32>
    %103 = vector.broadcast %102 : vector<1x256xf32> to vector<32x256xf32>
    %104 = arith.addf %101, %103 : vector<32x256xf32>
    %c0_59 = arith.constant 0 : index
    %c0_60 = arith.constant 0 : index
    %105 = vector.load %arg11[%c0_59, %c0_60] : memref<32x256xf32, #tpu.memory_space<vmem>>, vector<32x256xf32>
    tpu.vector_store %arg11[%c0_59, %c0_60], %104 {strides = array<i32>} : memref<32x256xf32, #tpu.memory_space<vmem>>, vector<32x256xf32>,
    return
  }
  func.func @transform_0(%arg0: i32) -> (i32, i32) {
    %c0_i32 = arith.constant 0 : i32
    %c0_i32_0 = arith.constant 0 : i32
    %c0_i32_1 = arith.constant 0 : i32
    return %c0_i32, %c0_i32_0 : i32, i32
  }
  func.func @transform_1(%arg0: i32) -> (i32, i32, i32) {
    %c0_i32 = arith.constant 0 : i32
    %c0_i32_0 = arith.constant 0 : i32
    %c0_i32_1 = arith.constant 0 : i32
    %c0_i32_2 = arith.constant 0 : i32
    return %c0_i32, %c0_i32_0, %c0_i32_1 : i32, i32, i32
  }
  func.func @transform_2(%arg0: i32) -> (i32, i32) {
    %c0_i32 = arith.constant 0 : i32
    %c0_i32_0 = arith.constant 0 : i32
    %c0_i32_1 = arith.constant 0 : i32
    return %c0_i32, %c0_i32_0 : i32, i32
  }
  func.func @transform_3(%arg0: i32) -> (i32, i32, i32) {
    %c0_i32 = arith.constant 0 : i32
    %c0_i32_0 = arith.constant 0 : i32
    %c0_i32_1 = arith.constant 0 : i32
    %c0_i32_2 = arith.constant 0 : i32
    return %c0_i32, %c0_i32_0, %c0_i32_1 : i32, i32, i32
  }
  func.func @transform_4(%arg0: i32) -> (i32, i32) {
    %c0_i32 = arith.constant 0 : i32
    %c0_i32_0 = arith.constant 0 : i32
    %c0_i32_1 = arith.constant 0 : i32
    return %c0_i32, %c0_i32_0 : i32, i32
  }
  func.func @transform_5(%arg0: i32) -> (i32, i32) {
    %c0_i32 = arith.constant 0 : i32
    %c0_i32_0 = arith.constant 0 : i32
    %c0_i32_1 = arith.constant 0 : i32
    return %c0_i32, %c0_i32_0 : i32, i32
  }
  func.func @transform_6(%arg0: i32) -> (i32, i32) {
    %c0_i32 = arith.constant 0 : i32
    %c0_i32_0 = arith.constant 0 : i32
    %c0_i32_1 = arith.constant 0 : i32
    return %c0_i32, %c0_i32_0 : i32, i32
  }
  func.func @transform_7(%arg0: i32) -> (i32, i32) {
    %c0_i32 = arith.constant 0 : i32
    %c0_i32_0 = arith.constant 0 : i32
    %c0_i32_1 = arith.constant 0 : i32
    return %c0_i32, %c0_i32_0 : i32, i32
  }
  func.func @transform_8(%arg0: i32) -> (i32, i32) {
    %c0_i32 = arith.constant 0 : i32
    %c0_i32_0 = arith.constant 0 : i32
    %c0_i32_1 = arith.constant 0 : i32
    return %c0_i32, %c0_i32_0 : i32, i32
  }
  func.func @transform_9(%arg0: i32) -> (i32, i32) {
    %c0_i32 = arith.constant 0 : i32
    %c0_i32_0 = arith.constant 0 : i32
    %c0_i32_1 = arith.constant 0 : i32
    return %c0_i32, %c0_i32_0 : i32, i32
  }
  func.func @transform_10(%arg0: i32) -> (i32, i32) {
    %c0_i32 = arith.constant 0 : i32
    %c0_i32_0 = arith.constant 0 : i32
    %c0_i32_1 = arith.constant 0 : i32
    return %c0_i32, %c0_i32_0 : i32, i32
  }
}

</mosaic_0001>

<bundles_post_ra>
// kernel: tpu_custom_call.1
= control target key start
LH: loop header
LB: loop body
LE: loop exit
PB: predicated region body
PF: predicated region fallthrough
CT: control target
= control target key end

     0   :  { %15 = vsyncpa [#allocation3], 0  ;;  %s1297_s0 = inlined_call_operand.hbm [shape: f32[32,64], index: 0, kind: input, shape index: {}]   ;;  %s1298_s1 = inlined_call_operand.hbm [shape: f32[3,64,128], index: 1, kind: input, shape index: {}]   ;;  %s1299_s2 = inlined_call_operand.vmem [shape: f32[1,128], index: 2, kind: input, shape index: {}]   ;;  %s1300_s3 = inlined_call_operand.hbm [shape: f32[3,128,128], index: 3, kind: input, shape index: {}]   ;;  %s1301_s4 = inlined_call_operand.hbm [shape: f32[1,128], index: 4, kind: input, shape index: {}]   ;;  %s1302_s5 = inlined_call_operand.vmem [shape: f32[1,128], index: 5, kind: input, shape index: {}]   ;;  %s1303_s6 = inlined_call_operand.vmem [shape: f32[1,128], index: 6, kind: input, shape index: {}]   ;;  %s1304_s7 = inlined_call_operand.hbm [shape: f32[128,128], index: 7, kind: input, shape index: {}]   ;;  %s1305_s8 = inlined_call_operand.hbm [shape: f32[128,256], index: 8, kind: input, shape index: {}]   ;;  %s1306_s9 = inlined_call_operand.vmem [shape: f32[1,256], index: 9, kind: input, shape index: {}]   ;;  %s1307_s10 = inlined_call_operand.hbm [shape: f32[32,256], index: 10, kind: output, shape index: {}]  }
   0x1   :  { %16 = vsyncpa [#allocation6], 0 }
   0x2   :  { %17 = vsyncpa [#allocation9], 0 }
   0x3   :  { %18 = vsyncpa [#allocation12], 0 }
   0x4   :  { %19 = vsyncpa [#allocation4], 0  ;;  %s37_s15 = sshll.u32 %s1298_s1, 4  ;;  %s1048_s16 = smov [#allocation5]   ;;  %s38_s15 = int_to_ptr.hbm [resolvable:$true] %s37_s15 }
   0x5   :  { %s39_s17 = sshll.u32 %s1048_s16, 4  ;;  %s66_s20 = sshll.u32 %s1301_s4, 4  ;;  %s40_s17 = int_to_ptr.vmem [resolvable:$true] %s39_s17  ;;  %s67_s20 = int_to_ptr.hbm [resolvable:$true] %s66_s20 }
   0x6   :  { %s1049_s21 = smov 128   ;;  %s1050_s22 = smov 8  }
   0x7   :  { %45 = dma.hbm_to_vmem [thread:$0]  %s38_s15, 3072, %s40_s17, [#allocation6], %s1049_s21, %s1049_s21, %s1050_s22  }
   0x8   :  { %s1051_s23 = smov [#allocation8]   ;;  %s24_s1 = sshll.u32 %s1297_s0, 4  ;;  %s25_s1 = int_to_ptr.hbm [resolvable:$true] %s24_s1 }
   0x9   :  { %s68_s24 = sshll.u32 %s1051_s23, 4  ;;  %s52_s4 = sshll.u32 %s1300_s3, 4  ;;  %s69_s24 = int_to_ptr.vmem [resolvable:$true] %s68_s24  ;;  %s53_s4 = int_to_ptr.hbm [resolvable:$true] %s52_s4 }
   0xa   :  { %71 = dma.hbm_to_vmem [thread:$0]  %s67_s20, 16, %s69_s24, [#allocation9]  }
   0xb   :  { %s1052_s29 = smov [#allocation2]   ;;  %s1053_s11 = smov [#allocation7]  }
   0xc   :  { %s26_s30 = sshll.u32 %s1052_s29, 4  ;;  %s54_s12 = sshll.u32 %s1053_s11, 4  ;;  %s27_s30 = int_to_ptr.vmem [resolvable:$true] %s26_s30  ;;  %s55_s12 = int_to_ptr.vmem [resolvable:$true] %s54_s12 }
   0xd   :  { %32 = dma.hbm_to_vmem [thread:$0]  %s25_s1, 512, %s27_s30, [#allocation3], %s1049_s21, %s1049_s21, %s1050_s22  }
   0xe   :  { %s80_s0 = sshll.u32 %s1304_s7, 4  ;;  %s93_s16 = sshll.u32 %s1305_s8, 4  ;;  %s81_s0 = int_to_ptr.hbm [resolvable:$true] %s80_s0  ;;  %s94_s16 = int_to_ptr.hbm [resolvable:$true] %s93_s16 }
   0xf   :  { %60 = dma.hbm_to_vmem [thread:$0]  %s53_s4, 6144, %s55_s12, [#allocation6], %s1049_s21, %s1049_s21, %s1050_s22  }
  0x10   :  { %s1054_s17 = smov [#allocation10]   ;;  %s1055_s19 = smov [#allocation11]  }
  0x11   :  { %s82_s18 = sshll.u32 %s1054_s17, 4  ;;  %s95_s7 = sshll.u32 %s1055_s19, 4  ;;  %s83_s18 = int_to_ptr.vmem [resolvable:$true] %s82_s18  ;;  %s96_s7 = int_to_ptr.vmem [resolvable:$true] %s95_s7 }
  0x12   :  { %88 = dma.hbm_to_vmem [thread:$0]  %s81_s0, 2048, %s83_s18, [#allocation9], %s1049_s21, %s1049_s21, %s1050_s22  }
  0x13   :  { %s1056_s20 = smov 256   ;;  %s1057_s23 = smov 16  }
  0x14   :  { %101 = dma.hbm_to_vmem [thread:$0]  %s94_s16, 4096, %s96_s7, [#allocation12], %s1056_s20, %s1056_s20, %s1057_s23  }
  0x15   :  { %1038 = dma.done.wait [#allocation3], 512  }
  0x16   :  { %1039 = vsyncadd [#allocation3], 4294966784 }
  0x17   :  { %1040 = dma.done.wait [#allocation6], 9216  }
  0x18   :  { %1041 = vsyncadd [#allocation6], 4294958080 }
  0x19   :  { %1042 = dma.done.wait [#allocation9], 2064  }
  0x1a   :  { %1043 = vsyncadd [#allocation9], 4294965232 }
  0x1b   :  { %1044 = dma.done.wait [#allocation12], 4096  }
  0x1c   :  { %1045 = vsyncadd [#allocation12], 4294963200  ;;  %v128_v0 = vlaneseq  ;;  %v242_v1 = vld [vmem:[#allocation5 + $0x38] sm:$0xff]  ;;  %v241_v2 = vld [vmem:[#allocation5 + $0x30] sm:$0xff]  ;;  %vm252_vm3 = vcmask 523264   ;;  %s805_s28 = sshll.u32 %s1307_s10, 4  ;;  %s806_s28 = int_to_ptr.hbm [resolvable:$true] %s805_s28 }
  0x1d   :  { %v343_v3 = vld [vmem:[#allocation5 + $0xb8] sm:$0xff]  ;;  %314 = vmatpush.msra.mxu3 %v242_v1  ;;  %v342_v4 = vld [vmem:[#allocation5 + $0xb0] sm:$0xff]  ;;  %v240_v6 = vld [vmem:[#allocation5 + $0x28] sm:$0xff] }
  0x1e   :  { %364 = vmatpush.msra.mxu2 %v343_v3  ;;  %v251_v5 = vld [vmem:[#allocation5 + $0x78] sm:$0xff]  ;;  %v341_v7 = vld [vmem:[#allocation5 + $0xa8] sm:$0xff]  ;;  %v250_v8 = vld [vmem:[#allocation5 + $0x70] sm:$0xff]  ;;  %v1147_v9 = vshrl.u32 %v128_v0, 7 }
  0x1f   :  { %273 = vmatpush.msra.mxu0 %v251_v5  ;;  %315 = vmatpush.msra.mxu3 %v241_v2  ;;  %v249_v10 = vld [vmem:[#allocation5 + $0x68] sm:$0xff]  ;;  %v239_v11 = vld [vmem:[#allocation5 + $0x20] sm:$0xff]  ;;  %v238_v14 = vld [vmem:[#allocation5 + $0x18] sm:$0xff] }
  0x20   :  { %365 = vmatpush.msra.mxu2 %v342_v4  ;;  %v340_v12 = vld [vmem:[#allocation5 + $0xa0] sm:$0xff]  ;;  %v339_v15 = vld [vmem:[#allocation5 + $0x98] sm:$0xff]  ;;  %v137_v16 = vand.u32 15, %v1147_v9  ;;  %vm197_vm0 = vcmp.lt.s32.totalorder %v1147_v9, 1  ;;  %v237_v21 = vld [vmem:[#allocation5 + $0x10] sm:$0xff]  ;;  %vm218_vm2 = vcmp.lt.s32.totalorder %v1147_v9, 7 }
  0x21   :  { %274 = vmatpush.msra.mxu0 %v250_v8  ;;  %316 = vmatpush.msra.mxu3 %v240_v6  ;;  %v248_v13 = vld [vmem:[#allocation5 + $0x60] sm:$0xff]  ;;  %v247_v18 = vld [vmem:[#allocation5 + $0x58] sm:$0xff]  ;;  %v338_v22 = vld [vmem:[#allocation5 + $0x90] sm:$0xff]  ;;  %v130_v32 = vadd.s32 8, %v1147_v9  ;;  %v131_v50 = vadd.s32 16, %v1147_v9  ;;  %v132_v1 = vadd.s32 24, %v1147_v9 }
  0x22   :  { %366 = vmatpush.msra.mxu2 %v341_v7  ;;  %v1150_v17 = vld [vmem:[#allocation2] sm:$0xff]  ;;  %v1152_v19 = vld [vmem:[#allocation2 + $0x18] sm:$0xff]  ;;  %v1157_v24 = vld [vmem:[#allocation2 + $0x8] sm:$0xff]  ;;  %vm1161_vm1 = vcmp.ne.s32.totalorder %v137_v16, 0 }
  0x23   :  { %275 = vmatpush.msra.mxu0 %v249_v10  ;;  %317 = vmatpush.msra.mxu3 %v239_v11  ;;  %v193_v20 = vrot.slane %v1150_v17, 7  ;;  %v196_v23 = vrot.slane %v1152_v19, 7  ;;  %v246_v25 = vld [vmem:[#allocation5 + $0x50] sm:$0xff]  ;;  %v214_v26 = vrot.slane %v1150_v17, 1  ;;  %v215_v27 = vrot.slane %v1157_v24, 1  ;;  %v236_v28 = vld [vmem:[#allocation5 + $0x8] sm:$0xff] }
  0x24   :  { %367 = vmatpush.msra.mxu2 %v340_v12  ;;  %v337_v29 = vld [vmem:[#allocation5 + $0x88] sm:$0xff]  ;;  %v1171_v34 = vld [vmem:[#allocation2 + $0x10] sm:$0xff]  ;;  %v235_v35 = vld [vmem:[#allocation5] sm:$0xff]  ;;  %v144_v41 = vand.u32 15, %v130_v32  ;;  %v194_v46 = vrot.slane %v1157_v24, 7  ;;  %v151_v56 = vand.u32 15, %v131_v50 }
  0x25   :  { %276 = vmatpush.msra.mxu0 %v248_v13  ;;  %318 = vmatpush.msra.mxu3 %v238_v14  ;;  %v201_v31 = vsel %vm197_vm0, %v196_v23, %v193_v20  ;;  %v245_v33 = vld [vmem:[#allocation5 + $0x48] sm:$0xff]  ;;  %v336_v36 = vld [vmem:[#allocation5 + $0x80] sm:$0xff]  ;;  %v532_v37 = vld [vmem:[#allocation7 + $0x178] sm:$0xff]  ;;  %v221_v39 = vsel %vm218_vm2, %v214_v26, %v215_v27  ;;  %v216_v42 = vrot.slane %v1171_v34, 1  ;;  %v195_v57 = vrot.slane %v1171_v34, 7 }
  0x26   :  { %368 = vmatpush.msra.mxu2 %v339_v15  ;;  %v210_v38 = vsel %vm1161_vm1, %v201_v31, 0.0  ;;  %v244_v40 = vld [vmem:[#allocation5 + $0x40] sm:$0xff]  ;;  %v457_v43 = vld [vmem:[#allocation7 + $0xf8] sm:$0xff]  ;;  %533 = vmatpush.msra.mxu1 %v532_v37  ;;  %v531_v44 = vld [vmem:[#allocation7 + $0x170] sm:$0xff]  ;;  %vm1185_vm4 = vcmp.ne.s32.totalorder %v144_v41, 15  ;;  %v200_v54 = vsel %vm197_vm0, %v193_v20, %v194_v46  ;;  %v217_v62 = vrot.slane %v1152_v19, 1 }
  0x27   :  { %277 = vmatpush.msra.mxu0 %v247_v18  ;;  %319 = vmatpush.msra.mxu3 %v237_v21  ;;  %v456_v45 = vld [vmem:[#allocation7 + $0xf0] sm:$0xff]  ;;  %v530_v47 = vld [vmem:[#allocation7 + $0x168] sm:$0xff]  ;;  %v220_v49 = vsel %vm218_vm2, %v215_v27, %v216_v42  ;;  %v529_v52 = vld [vmem:[#allocation7 + $0x160] sm:$0xff]  ;;  %vm1202_vm5 = vcmp.ne.s32.totalorder %v151_v56, 0  ;;  %v199_v0 = vsel %vm197_vm0, %v194_v46, %v195_v57  ;;  %v158_v6 = vand.u32 15, %v132_v1 }
  0x28   :  { %369 = vmatpush.msra.mxu2 %v338_v22  ;;  %v455_v51 = vld [vmem:[#allocation7 + $0xe8] sm:$0xff]  ;;  %534 = vmatpush.msra.mxu1 %v531_v44  ;;  %v454_v53 = vld [vmem:[#allocation7 + $0xe0] sm:$0xff]  ;;  %v232_v55 = vsel %vm1185_vm4, %v220_v49, 0.0  ;;  %v453_v58 = vld [vmem:[#allocation7 + $0xd8] sm:$0xff]  ;;  %v212_v4 = vsel %vm1202_vm5, %v199_v0, 0.0  ;;  %v219_v5 = vsel %vm218_vm2, %v216_v42, %v217_v62  ;;  %v222_v11 = vsel %vm218_vm2, %v217_v62, %v214_v26 }
  0x29   :  { %278 = vmatpush.msra.mxu0 %v246_v25  ;;  %320 = vmatpush.msra.mxu3 %v236_v28  ;;  %v528_v59 = vld [vmem:[#allocation7 + $0x158] sm:$0xff]  ;;  %v452_v60 = vld [vmem:[#allocation7 + $0xd0] sm:$0xff]  ;;  %v451_v2 = vld [vmem:[#allocation7 + $0xc8] sm:$0xff]  ;;  %vm1217_vm6 = vcmp.ne.s32.totalorder %v158_v6, 15  ;;  %v198_v13 = vsel %vm197_vm0, %v195_v57, %v196_v23 }
  0x2a   :  { %370 = vmatpush.msra.mxu2 %v337_v29  ;;  %535 = vmatpush.msra.mxu1 %v530_v47  ;;  %v527_v61 = vld [vmem:[#allocation7 + $0x150] sm:$0xff]  ;;  %v450_v3 = vld [vmem:[#allocation7 + $0xc0] sm:$0xff]  ;;  %v449_v7 = vld [vmem:[#allocation7 + $0xb8] sm:$0xff]  ;;  %v234_v14 = vsel %vm1217_vm6, %v222_v11, 0.0 }
  0x2b   :  { %279 = vmatpush.msra.mxu0 %v245_v33  ;;  %321 = vmatpush.msra.mxu3 %v235_v35  ;;  %v448_v8 = vld [vmem:[#allocation7 + $0xb0] sm:$0xff]  ;;  %v447_v12 = vld [vmem:[#allocation7 + $0xa8] sm:$0xff]  ;;  %v446_v15 = vld [vmem:[#allocation7 + $0xa0] sm:$0xff] }
  0x2c   :  { %371 = vmatpush.msra.mxu2 %v336_v36  ;;  %825 = vmatmul.msk.f32.vlgmr.msra.gmra.mxu3 %vm252_vm3, %v210_v38  ;;  %v526_v16 = vld [vmem:[#allocation7 + $0x148] sm:$0xff]  ;;  %v525_v18 = vld [vmem:[#allocation7 + $0x140] sm:$0xff]  ;;  %v444_v20 = vld [vmem:[#allocation7 + $0x90] sm:$0xff] }
  0x2d   :  { %829 = vmatmul.msk.f32.vlgmr.msra.gmra.mxu2 %vm252_vm3, %v221_v39  ;;  %280 = vmatpush.msra.mxu0 %v244_v40  ;;  %v440_v21 = vld [vmem:[#allocation7 + $0x78] sm:$0xff]  ;;  %v443_v23 = vld [vmem:[#allocation7 + $0x88] sm:$0xff]  ;;  %v523_v25 = vld [vmem:[#allocation7 + $0x130] sm:$0xff] }
  0x2e   :  { %458 = vmatpush.msrb.mxu3 %v457_v43  ;;  %821 = vmatmul.msk.f32.vlgmr.msra.gmra.mxu0 %vm252_vm3, %v1150_v17  ;;  %v445_v17 = vld [vmem:[#allocation7 + $0x98] sm:$0xff]  ;;  %v438_v26 = vld [vmem:[#allocation7 + $0x68] sm:$0xff]  ;;  %v437_v28 = vld [vmem:[#allocation7 + $0x60] sm:$0xff] }
  0x2f   :  { %536 = vmatpush.msra.mxu1 %v529_v52  ;;  %v524_v22 = vld [vmem:[#allocation7 + $0x138] sm:$0xff]  ;;  %487 = vmatpush.msrb.mxu2 %v440_v21  ;;  %v522_v27 = vld [vmem:[#allocation7 + $0x128] sm:$0xff]  ;;  %v521_v29 = vld [vmem:[#allocation7 + $0x120] sm:$0xff] }
  0x30   :  { %459 = vmatpush.msrb.mxu3 %v456_v45  ;;  %v436_v31 = vld [vmem:[#allocation7 + $0x58] sm:$0xff]  ;;  %v435_v33 = vld [vmem:[#allocation7 + $0x50] sm:$0xff]  ;;  %v434_v35 = vld [vmem:[#allocation7 + $0x48] sm:$0xff] }
  0x31   :  { %537 = vmatpush.msra.mxu1 %v528_v59  ;;  %v520_v32 = vld [vmem:[#allocation7 + $0x118] sm:$0xff]  ;;  %v518_v36 = vld [vmem:[#allocation7 + $0x108] sm:$0xff]  ;;  %v433_v37 = vld [vmem:[#allocation7 + $0x40] sm:$0xff] }
  0x32   :  { %460 = vmatpush.msrb.mxu3 %v455_v51  ;;  %v517_v38 = vld [vmem:[#allocation7 + $0x100] sm:$0xff]  ;;  %v432_v39 = vld [vmem:[#allocation7 + $0x38] sm:$0xff]  ;;  %v431_v40 = vld [vmem:[#allocation7 + $0x30] sm:$0xff] }
  0x33   :  { %538 = vmatpush.msra.mxu1 %v527_v61  ;;  %v430_v41 = vld [vmem:[#allocation7 + $0x28] sm:$0xff]  ;;  %v429_v42 = vld [vmem:[#allocation7 + $0x20] sm:$0xff]  ;;  %v428_v44 = vld [vmem:[#allocation7 + $0x18] sm:$0xff] }
  0x34   :  { %461 = vmatpush.msrb.mxu3 %v454_v53  ;;  %v427_v45 = vld [vmem:[#allocation7 + $0x10] sm:$0xff]  ;;  %v426_v49 = vld [vmem:[#allocation7 + $0x8] sm:$0xff]  ;;  %v864_v51 = vld [vmem:[%s1299_s2] ss:$0 sm:$0xff] }
  0x35   :  { %826 = vmatmul.msk.f32.gmra.mxu3 %vm252_vm3, %v200_v54  ;;  %830 = vmatmul.msk.f32.gmra.mxu2 %vm252_vm3, %v232_v55  ;;  %v425_v52 = vld [vmem:[#allocation7] sm:$0xff]  ;;  %v597_v63 = vld [vmem:[#allocation10 + $0x50] sm:$0xff]  ;;  %v596_v9 = vld [vmem:[#allocation10 + $0x48] sm:$0xff] }
  0x36   :  { %462 = vmatpush.msrb.mxu3 %v453_v58  ;;  %822 = vmatmul.msk.f32.gmra.mxu0 %vm252_vm3, %v1157_v24  ;;  %v439_v24 = vld [vmem:[#allocation7 + $0x70] sm:$0xff]  ;;  %v599_v10 = vld [vmem:[#allocation10 + $0x60] sm:$0xff] }
  0x37   :  { %539 = vmatpush.msra.mxu1 %v526_v16  ;;  %488 = vmatpush.msrb.mxu2 %v439_v24 }
  0x38   :  { %463 = vmatpush.msrb.mxu3 %v452_v60 }
  0x39   :  { %540 = vmatpush.msra.mxu1 %v525_v18  ;;  %489 = vmatpush.msrb.mxu2 %v438_v26 }
  0x3a   :  { %464 = vmatpush.msrb.mxu3 %v451_v2 }
  0x3b   :  { %541 = vmatpush.msra.mxu1 %v524_v22  ;;  %490 = vmatpush.msrb.mxu2 %v437_v28 }
  0x3c   :  { %465 = vmatpush.msrb.mxu3 %v450_v3 }
  0x3d   :  { %827 = vmatmul.msk.f32.gmra.mxu3 %vm252_vm3, %v212_v4  ;;  %831 = vmatmul.msk.f32.gmra.mxu2 %vm252_vm3, %v219_v5 }
  0x3e   :  { %466 = vmatpush.msrb.mxu3 %v449_v7  ;;  %823 = vmatmul.msk.f32.gmra.mxu0 %vm252_vm3, %v1171_v34  ;;  %v519_v34 = vld [vmem:[#allocation7 + $0x110] sm:$0xff] }
  0x3f   :  { %542 = vmatpush.msra.mxu1 %v523_v25  ;;  %491 = vmatpush.msrb.mxu2 %v436_v31  ;;  %v602_v31 = vld [vmem:[#allocation10 + $0x78] sm:$0xff] }
  0x40   :  { %467 = vmatpush.msrb.mxu3 %v448_v8 }
  0x41   :  { %543 = vmatpush.msra.mxu1 %v522_v27  ;;  %492 = vmatpush.msrb.mxu2 %v435_v33  ;;  %v600_v33 = vld [vmem:[#allocation10 + $0x68] sm:$0xff] }
  0x42   :  { %468 = vmatpush.msrb.mxu3 %v447_v12 }
  0x43   :  { %544 = vmatpush.msra.mxu1 %v521_v29  ;;  %493 = vmatpush.msrb.mxu2 %v434_v35 }
  0x44   :  { %469 = vmatpush.msrb.mxu3 %v446_v15 }
  0x45   :  { %828 = vmatmul.msk.f32.gmra.mxu3 %vm252_vm3, %v198_v13  ;;  %832 = vmatmul.msk.f32.gmra.mxu2 %vm252_vm3, %v234_v14 }
  0x46   :  { %824 = vmatmul.msk.f32.gmra.mxu0 %vm252_vm3, %v1152_v19  ;;  %470 = vmatpush.msrb.mxu3 %v445_v17  ;;  %v442_v19 = vld [vmem:[#allocation7 + $0x80] sm:$0xff] }
  0x47   :  { %545 = vmatpush.msra.mxu1 %v520_v32  ;;  %494 = vmatpush.msrb.mxu2 %v433_v37  ;;  %v601_v32 = vld [vmem:[#allocation10 + $0x70] sm:$0xff]  ;;  %v595_v37 = vld [vmem:[#allocation10 + $0x40] sm:$0xff] }
  0x48   :  { %471 = vmatpush.msrb.mxu3 %v444_v20 }
  0x49   :  { %546 = vmatpush.msra.mxu1 %v519_v34  ;;  %495 = vmatpush.msrb.mxu2 %v432_v39  ;;  %v598_v34 = vld [vmem:[#allocation10 + $0x58] sm:$0xff] }
  0x4a   :  { %472 = vmatpush.msrb.mxu3 %v443_v23 }
  0x4b   :  { %547 = vmatpush.msra.mxu1 %v518_v36  ;;  %496 = vmatpush.msrb.mxu2 %v431_v40  ;;  %v593_v40 = vld [vmem:[#allocation10 + $0x30] sm:$0xff] }
  0x4c   :  { %473 = vmatpush.msrb.mxu3 %v442_v19 }
  0x4d   :  { %548 = vmatpush.msra.mxu1 %v517_v38  ;;  %497 = vmatpush.msrb.mxu2 %v430_v41  ;;  %v594_v38 = vld [vmem:[#allocation10 + $0x38] sm:$0xff]  ;;  %v592_v41 = vld [vmem:[#allocation10 + $0x28] sm:$0xff] }
  0x4e   :  { %642 = vmatpush.msra.mxu3 %v602_v31 }
  0x4f   :  { %498 = vmatpush.msrb.mxu2 %v429_v42 }
  0x50   :  { %643 = vmatpush.msra.mxu3 %v601_v32 }
  0x51   :  { %499 = vmatpush.msrb.mxu2 %v428_v44 }
  0x52   :  { %644 = vmatpush.msra.mxu3 %v600_v33 }
  0x53   :  { %500 = vmatpush.msrb.mxu2 %v427_v45  ;;  %v590_v45 = vld [vmem:[#allocation10 + $0x18] sm:$0xff] }
  0x54   :  { %645 = vmatpush.msra.mxu3 %v599_v10 }
  0x55   :  { %501 = vmatpush.msrb.mxu2 %v426_v49  ;;  %v588_v49 = vld [vmem:[#allocation10 + $0x8] sm:$0xff] }
  0x56   :  { %646 = vmatpush.msra.mxu3 %v598_v34 }
  0x57   :  { %502 = vmatpush.msrb.mxu2 %v425_v52 }
  0x58   :  { %647 = vmatpush.msra.mxu3 %v597_v63 }
  0x59   :  { %603 = vmatpush.msra.mxu2 %v602_v31 }
  0x5a   :  { %648 = vmatpush.msra.mxu3 %v596_v9 }
  0x5b   :  { %604 = vmatpush.msra.mxu2 %v601_v32 }
  0x5c   :  { %649 = vmatpush.msra.mxu3 %v595_v37 }
  0x5d   :  { %605 = vmatpush.msra.mxu2 %v600_v33 }
  0x5e   :  { %650 = vmatpush.msra.mxu3 %v594_v38 }
  0x5f   :  { %606 = vmatpush.msra.mxu2 %v599_v10 }
  0x60   :  { %651 = vmatpush.msra.mxu3 %v593_v40 }
  0x61   :  { %607 = vmatpush.msra.mxu2 %v598_v34 }
  0x62   :  { %652 = vmatpush.msra.mxu3 %v592_v41 }
  0x63   :  { %608 = vmatpush.msra.mxu2 %v597_v63 }
  0x65   :  { %609 = vmatpush.msra.mxu2 %v596_v9 }
  0x67   :  { %610 = vmatpush.msra.mxu2 %v595_v37 }
  0x69   :  { %611 = vmatpush.msra.mxu2 %v594_v38 }
  0x6b   :  { %612 = vmatpush.msra.mxu2 %v593_v40  ;;  %v723_v40 = vld [vmem:[#allocation11 + $0xe0] sm:$0xff] }
  0x6d   :  { %613 = vmatpush.msra.mxu2 %v592_v41  ;;  %v724_v41 = vld [vmem:[#allocation11 + $0xe8] sm:$0xff] }
  0xab   :  { %v282_v43 = vpop.f32.mrf.mxu0 }
  0xaf   :  { %v323_v46 = vpop.f32.mrf.mxu3 }
  0xb0   :  { %v373_v47 = vpop.f32.mrf.mxu2  ;;  %v324_v50 = vadd.f32 %v323_v46, %v282_v43  ;;  %v591_v43 = vld [vmem:[#allocation10 + $0x20] sm:$0xff]  ;;  %v589_v46 = vld [vmem:[#allocation10 + $0x10] sm:$0xff] }
  0xb1   :  { %614 = vmatpush.msra.mxu2 %v591_v43  ;;  %653 = vmatpush.msra.mxu3 %v591_v43  ;;  %v722_v43 = vld [vmem:[#allocation11 + $0xd8] sm:$0xff] }
  0xb2   :  { %v385_v53 = vadd.f32 %v373_v47, %v324_v50  ;;  %v587_v50 = vld [vmem:[#allocation10] sm:$0xff] }
  0xb3   :  { %v285_v54 = vpop.f32.mrf.mxu0  ;;  %615 = vmatpush.msra.mxu2 %v590_v45  ;;  %654 = vmatpush.msra.mxu3 %v590_v45  ;;  %v720_v45 = vld [vmem:[#allocation11 + $0xc8] sm:$0xff] }
  0xb4   :  { %v393_v55 = vadd.f32 %v864_v51, %v385_v53 }
  0xb5   :  { %616 = vmatpush.msra.mxu2 %v589_v46  ;;  %655 = vmatpush.msra.mxu3 %v589_v46  ;;  %v717_v46 = vld [vmem:[#allocation11 + $0xb0] sm:$0xff] }
  0xb6   :  { %v397_v56 = vmax.f32 %v393_v55, 0.0 }
  0xb7   :  { %617 = vmatpush.msra.mxu2 %v588_v49  ;;  %656 = vmatpush.msra.mxu3 %v588_v49  ;;  %v715_v49 = vld [vmem:[#allocation11 + $0xa0] sm:$0xff] }
  0xb8   :  { %v326_v57 = vpop.f32.mrf.mxu3  ;;  %v376_v58 = vpop.f32.mrf.mxu2  ;;  %474 = vmatmul.f32.vlgmr.msrb.gmra.mxu3 %v397_v56  ;;  %v413_v4 = vrot.slane %v397_v56, 1  ;;  %v401_v22 = vrot.slane %v397_v56, 7 }
  0xb9   :  { %v327_v59 = vadd.f32 %v326_v57, %v285_v54  ;;  %618 = vmatpush.msra.mxu2 %v587_v50  ;;  %657 = vmatpush.msra.mxu3 %v587_v50  ;;  %v716_v50 = vld [vmem:[#allocation11 + $0xa8] sm:$0xff] }
  0xbb   :  { %v386_v60 = vadd.f32 %v376_v58, %v327_v59  ;;  %v288_v61 = vpop.f32.mrf.mxu0  ;;  %v865_v59 = vld [vmem:[#allocation8] ss:$0 sm:$0xff] }
  0xbd   :  { %v394_v62 = vadd.f32 %v864_v51, %v386_v60 }
  0xbf   :  { %v398_v0 = vmax.f32 %v394_v62, 0.0 }
  0xc0   :  { %v329_v1 = vpop.f32.mrf.mxu3  ;;  %v379_v2 = vpop.f32.mrf.mxu2 }
  0xc1   :  { %v330_v3 = vadd.f32 %v329_v1, %v288_v61  ;;  %477 = vmatmul.f32.gmra.mxu3 %v398_v0  ;;  %v414_v5 = vrot.slane %v398_v0, 1  ;;  %v402_v26 = vrot.slane %v398_v0, 7 }
  0xc3   :  { %v387_v6 = vadd.f32 %v379_v2, %v330_v3  ;;  %v419_v7 = vsel %vm218_vm2, %v413_v4, %v414_v5  ;;  %v291_v11 = vpop.f32.mrf.mxu0  ;;  %v407_v48 = vsel %vm197_vm0, %v401_v22, %v402_v26 }
  0xc4   :  { %549 = vmatmul.f32.vlgmr.msra.gmra.mxu1 %v419_v7 }
  0xc5   :  { %v395_v8 = vadd.f32 %v864_v51, %v387_v6 }
  0xc7   :  { %v399_v12 = vmax.f32 %v395_v8, 0.0 }
  0xc8   :  { %v332_v13 = vpop.f32.mrf.mxu3  ;;  %v382_v14 = vpop.f32.mrf.mxu2 }
  0xc9   :  { %v333_v15 = vadd.f32 %v332_v13, %v291_v11  ;;  %480 = vmatmul.f32.gmra.mxu3 %v399_v12  ;;  %v415_v16 = vrot.slane %v399_v12, 1  ;;  %v403_v28 = vrot.slane %v399_v12, 7 }
  0xcb   :  { %v388_v17 = vadd.f32 %v382_v14, %v333_v15  ;;  %v418_v18 = vsel %vm218_vm2, %v414_v5, %v415_v16  ;;  %v406_v29 = vsel %vm197_vm0, %v402_v26, %v403_v28 }
  0xcc   :  { %835 = vmatmul.msk.f32.gmra.mxu1 %vm1185_vm4, %v418_v18 }
  0xcd   :  { %v396_v20 = vadd.f32 %v864_v51, %v388_v17 }
  0xcf   :  { %v400_v21 = vmax.f32 %v396_v20, 0.0 }
  0xd1   :  { %v404_v23 = vrot.slane %v400_v21, 7  ;;  %483 = vmatmul.f32.gmra.mxu3 %v400_v21  ;;  %v416_v24 = vrot.slane %v400_v21, 1 }
  0xd3   :  { %v408_v25 = vsel %vm197_vm0, %v404_v23, %v401_v22  ;;  %v417_v19 = vsel %vm218_vm2, %v415_v16, %v416_v24  ;;  %v420_v27 = vsel %vm218_vm2, %v416_v24, %v413_v4  ;;  %v405_v30 = vsel %vm197_vm0, %v403_v28, %v404_v23  ;;  %v725_v23 = vld [vmem:[#allocation11 + $0xf0] sm:$0xff] }
  0xd4   :  { %833 = vmatmul.msk.f32.vlgmr.msrb.gmra.mxu2 %vm1161_vm1, %v408_v25  ;;  %555 = vmatmul.f32.gmra.mxu1 %v417_v19 }
  0xd5   :  { %733 = vmatpush.msrb.mxu0 %v725_v23 }
  0xd7   :  { %734 = vmatpush.msrb.mxu0 %v723_v40 }
  0xdc   :  { %506 = vmatmul.f32.gmra.mxu2 %v407_v48  ;;  %836 = vmatmul.msk.f32.gmra.mxu1 %vm1217_vm6, %v420_v27 }
  0xe4   :  { %834 = vmatmul.msk.f32.gmra.mxu2 %vm1202_vm5, %v406_v29 }
  0xec   :  { %512 = vmatmul.f32.gmra.mxu2 %v405_v30 }
 0x13b   :  { %v475_v35 = vpop.f32.mrf.mxu3 }
 0x141   :  { %v550_v36 = vpop.f32.mrf.mxu1 }
 0x144   :  { %v478_v42 = vpop.f32.mrf.mxu3 }
 0x149   :  { %v553_v44 = vpop.f32.mrf.mxu1 }
 0x14c   :  { %v481_v52 = vpop.f32.mrf.mxu3 }
 0x151   :  { %v556_v54 = vpop.f32.mrf.mxu1 }
 0x154   :  { %v484_v1 = vpop.f32.mrf.mxu3 }
 0x157   :  { %v504_v39 = vpop.f32.mrf.mxu2 }
 0x158   :  { %v505_v53 = vadd.f32 %v504_v39, %v475_v35  ;;  %v726_v39 = vld [vmem:[#allocation11 + $0xf8] sm:$0xff] }
 0x159   :  { %v559_v5 = vpop.f32.mrf.mxu1  ;;  %837 = vmatpush.msrb.mxu1 %v726_v39 }
 0x15a   :  { %v562_v58 = vadd.f32 %v550_v36, %v505_v53  ;;  %v711_v53 = vld [vmem:[#allocation11 + $0x80] sm:$0xff] }
 0x15b   :  { %838 = vmatpush.msrb.mxu1 %v724_v41 }
 0x15c   :  { %v570_v62 = vadd.f32 %v865_v59, %v562_v58  ;;  %v708_v58 = vld [vmem:[#allocation11 + $0x68] sm:$0xff] }
 0x15d   :  { %839 = vmatpush.msrb.mxu1 %v722_v43 }
 0x15e   :  { %v574_v6 = vmax.f32 %v570_v62, 0.0  ;;  %v704_v62 = vld [vmem:[#allocation11 + $0x48] sm:$0xff] }
 0x15f   :  { %v507_v47 = vpop.f32.mrf.mxu2  ;;  %840 = vmatpush.msrb.mxu1 %v720_v45 }
 0x160   :  { %v508_v51 = vadd.f32 %v507_v47, %v478_v42  ;;  %v721_v42 = vld [vmem:[#allocation11 + $0xd0] sm:$0xff]  ;;  %v718_v47 = vld [vmem:[#allocation11 + $0xb8] sm:$0xff] }
 0x161   :  { %735 = vmatpush.msrb.mxu0 %v721_v42  ;;  %841 = vmatpush.msrb.mxu1 %v718_v47 }
 0x162   :  { %v563_v56 = vadd.f32 %v553_v44, %v508_v51  ;;  %v719_v44 = vld [vmem:[#allocation11 + $0xc0] sm:$0xff]  ;;  %v713_v51 = vld [vmem:[#allocation11 + $0x90] sm:$0xff] }
 0x163   :  { %736 = vmatpush.msrb.mxu0 %v719_v44  ;;  %842 = vmatpush.msrb.mxu1 %v716_v50 }
 0x164   :  { %v571_v61 = vadd.f32 %v865_v59, %v563_v56  ;;  %v710_v56 = vld [vmem:[#allocation11 + $0x78] sm:$0xff] }
 0x165   :  { %737 = vmatpush.msrb.mxu0 %v717_v46 }
 0x166   :  { %v575_v3 = vmax.f32 %v571_v61, 0.0  ;;  %v703_v61 = vld [vmem:[#allocation11 + $0x40] sm:$0xff] }
 0x167   :  { %v510_v55 = vpop.f32.mrf.mxu2  ;;  %738 = vmatpush.msrb.mxu0 %v715_v49 }
 0x168   :  { %v511_v57 = vadd.f32 %v510_v55, %v481_v52  ;;  %v578_v11 = vadd.f32 %v575_v3, %v574_v6  ;;  %v714_v52 = vld [vmem:[#allocation11 + $0x98] sm:$0xff]  ;;  %v709_v55 = vld [vmem:[#allocation11 + $0x70] sm:$0xff] }
 0x169   :  { %739 = vmatpush.msrb.mxu0 %v713_v51  ;;  %843 = vmatpush.msrb.mxu1 %v714_v52 }
 0x16a   :  { %v564_v60 = vadd.f32 %v556_v54, %v511_v57  ;;  %v712_v54 = vld [vmem:[#allocation11 + $0x88] sm:$0xff]  ;;  %v707_v57 = vld [vmem:[#allocation11 + $0x60] sm:$0xff] }
 0x16b   :  { %740 = vmatpush.msrb.mxu0 %v711_v53  ;;  %844 = vmatpush.msrb.mxu1 %v712_v54 }
 0x16c   :  { %v572_v0 = vadd.f32 %v865_v59, %v564_v60  ;;  %v706_v60 = vld [vmem:[#allocation11 + $0x58] sm:$0xff] }
 0x16d   :  { %741 = vmatpush.msrb.mxu0 %v709_v55  ;;  %845 = vmatpush.msrb.mxu1 %v710_v56 }
 0x16e   :  { %v576_v7 = vmax.f32 %v572_v0, 0.0  ;;  %v701_v0 = vld [vmem:[#allocation11 + $0x30] sm:$0xff] }
 0x16f   :  { %v513_v2 = vpop.f32.mrf.mxu2  ;;  %742 = vmatpush.msrb.mxu0 %v707_v57  ;;  %846 = vmatpush.msrb.mxu1 %v708_v58 }
 0x170   :  { %v514_v4 = vadd.f32 %v513_v2, %v484_v1  ;;  %v579_v13 = vadd.f32 %v578_v11, %v576_v7  ;;  %v702_v1 = vld [vmem:[#allocation11 + $0x38] sm:$0xff]  ;;  %v699_v2 = vld [vmem:[#allocation11 + $0x20] sm:$0xff] }
 0x171   :  { %847 = vmatpush.msrb.mxu1 %v706_v60 }
 0x172   :  { %v565_v8 = vadd.f32 %v559_v5, %v514_v4  ;;  %v697_v4 = vld [vmem:[#allocation11 + $0x10] sm:$0xff]  ;;  %v698_v5 = vld [vmem:[#allocation11 + $0x18] sm:$0xff] }
 0x173   :  { %848 = vmatpush.msrb.mxu1 %v704_v62 }
 0x174   :  { %v573_v12 = vadd.f32 %v865_v59, %v565_v8  ;;  %v705_v59 = vld [vmem:[#allocation11 + $0x50] sm:$0xff] }
 0x175   :  { %743 = vmatpush.msrb.mxu0 %v705_v59  ;;  %849 = vmatpush.msrb.mxu1 %v702_v1 }
 0x176   :  { %v577_v14 = vmax.f32 %v573_v12, 0.0 }
 0x177   :  { %744 = vmatpush.msrb.mxu0 %v703_v61 }
 0x178   :  { %v580_v15 = vadd.f32 %v579_v13, %v577_v14 }
 0x179   :  { %745 = vmatpush.msrb.mxu0 %v701_v0 }
 0x17a   :  { %v581_v16 = vrot.slane %v580_v15, 4 }
 0x17b   :  { %746 = vmatpush.msrb.mxu0 %v699_v2 }
 0x17c   :  { %v582_v17 = vadd.f32 %v581_v16, %v580_v15 }
 0x17d   :  { %747 = vmatpush.msrb.mxu0 %v697_v4 }
 0x17e   :  { %v583_v18 = vrot.slane %v582_v17, 2 }
 0x180   :  { %v584_v20 = vadd.f32 %v583_v18, %v582_v17 }
 0x182   :  { %v585_v21 = vrot.slane %v584_v20, 1 }
 0x184   :  { %v586_v22 = vadd.f32 %v585_v21, %v584_v20 }
 0x186   :  { %619 = vmatmul.f32.vlgmr.msra.gmra.mxu2 %v586_v22  ;;  %v866_v22 = vld [vmem:[%s1302_s5] ss:$0 sm:$0xff] }
 0x209   :  { %v620_v24 = vpop.f32.mrf.mxu2 }
 0x20a   :  { %v623_v25 = vmul.f32 0.001953125, %v620_v24  ;;  %v867_v24 = vld [vmem:[%s1303_s6] ss:$0 sm:$0xff] }
 0x20c   :  { %v624_v19 = vperm.slane %v623_v25, 0 }
 0x20e   :  { %v1262_v26 = vsub.f32 %v574_v6, %v624_v19  ;;  %v1264_v48 = vsub.f32 %v575_v3, %v624_v19  ;;  %v1266_v27 = vsub.f32 %v576_v7, %v624_v19  ;;  %v1268_v28 = vsub.f32 %v577_v14, %v624_v19  ;;  %v700_v3 = vld [vmem:[#allocation11 + $0x28] sm:$0xff]  ;;  %v695_v6 = vld [vmem:[#allocation11] sm:$0xff] }
 0x20f   :  { %850 = vmatpush.msrb.mxu1 %v700_v3  ;;  %v696_v7 = vld [vmem:[#allocation11 + $0x8] sm:$0xff]  ;;  %748 = vmatpush.msrb.mxu0 %v695_v6 }
 0x210   :  { %v629_v29 = vmul.f32 %v1262_v26, %v1262_v26  ;;  %v630_v30 = vmul.f32 %v1264_v48, %v1264_v48  ;;  %v631_v31 = vmul.f32 %v1266_v27, %v1266_v27  ;;  %v632_v33 = vmul.f32 %v1268_v28, %v1268_v28 }
 0x211   :  { %851 = vmatpush.msrb.mxu1 %v698_v5  ;;  %762 = vmatpush.msra.mxu0 %v726_v39 }
 0x212   :  { %v633_v32 = vadd.f32 %v630_v30, %v629_v29 }
 0x213   :  { %852 = vmatpush.msrb.mxu1 %v696_v7  ;;  %763 = vmatpush.msra.mxu0 %v724_v41 }
 0x214   :  { %v634_v10 = vadd.f32 %v633_v32, %v631_v31 }
 0x215   :  { %764 = vmatpush.msra.mxu0 %v722_v43 }
 0x216   :  { %v635_v34 = vadd.f32 %v634_v10, %v632_v33 }
 0x217   :  { %765 = vmatpush.msra.mxu0 %v720_v45 }
 0x218   :  { %v636_v63 = vrot.slane %v635_v34, 4 }
 0x219   :  { %766 = vmatpush.msra.mxu0 %v718_v47 }
 0x21a   :  { %v637_v35 = vadd.f32 %v636_v63, %v635_v34 }
 0x21b   :  { %767 = vmatpush.msra.mxu0 %v716_v50 }
 0x21c   :  { %v638_v9 = vrot.slane %v637_v35, 2 }
 0x21d   :  { %768 = vmatpush.msra.mxu0 %v714_v52 }
 0x21e   :  { %v639_v36 = vadd.f32 %v638_v9, %v637_v35 }
 0x21f   :  { %769 = vmatpush.msra.mxu0 %v712_v54 }
 0x220   :  { %v640_v37 = vrot.slane %v639_v36, 1 }
 0x221   :  { %770 = vmatpush.msra.mxu0 %v710_v56 }
 0x222   :  { %v641_v38 = vadd.f32 %v640_v37, %v639_v36 }
 0x223   :  { %771 = vmatpush.msra.mxu0 %v708_v58 }
 0x224   :  { %658 = vmatmul.f32.vlgmr.msra.gmra.mxu3 %v641_v38 }
 0x225   :  { %772 = vmatpush.msra.mxu0 %v706_v60 }
 0x227   :  { %773 = vmatpush.msra.mxu0 %v704_v62 }
 0x229   :  { %774 = vmatpush.msra.mxu0 %v702_v1 }
 0x22b   :  { %775 = vmatpush.msra.mxu0 %v700_v3 }
 0x22d   :  { %776 = vmatpush.msra.mxu0 %v698_v5 }
 0x22f   :  { %777 = vmatpush.msra.mxu0 %v696_v7 }
 0x2a7   :  { %v659_v8 = vpop.f32.mrf.mxu3 }
 0x2a8   :  { %v662_v11 = vmul.f32 0.001953125, %v659_v8 }
 0x2aa   :  { %v663_v12 = vadd.f32 1e-05, %v662_v11 }
 0x2ac   :  { %868 = vrsqrt.f32 %v663_v12  ;;  %vm670_vm8 = vweird.f32 %v663_v12 }
 0x2b2   :  { %v869_v13 = vpop.eup %868 }
 0x2b3   :  { %v665_v14 = vmul.f32 %v869_v13, %v663_v12  ;;  %vm671_vm7 = vweird.f32 %v869_v13 }
 0x2b4   :  { %vm672_vm9 = vmor %vm670_vm8, %vm671_vm7 }
 0x2b5   :  { %v666_v15 = vmul.f32 %v869_v13, %v665_v14 }
 0x2b7   :  { %v667_v16 = vmul.f32 0.5, %v666_v15 }
 0x2b9   :  { %v668_v17 = vsub.f32 1.5, %v667_v16 }
 0x2bb   :  { %v669_v18 = vmul.f32 %v869_v13, %v668_v17 }
 0x2bd   :  { %v673_v20 = vsel %vm672_vm9, %v869_v13, %v669_v18 }
 0x2be   :  { %v674_v21 = vperm.slane %v673_v20, 0 }
 0x2c0   :  { %v675_v23 = vmul.f32 %v674_v21, %v1262_v26  ;;  %v676_v25 = vmul.f32 %v674_v21, %v1264_v48  ;;  %v677_v32 = vmul.f32 %v674_v21, %v1266_v27  ;;  %v678_v26 = vmul.f32 %v674_v21, %v1268_v28  ;;  %v727_v48 = vld [vmem:[%s1306_s9] sm:$0x3]  ;;  %s1058_s9 = smov [#allocation13]  }
 0x2c1   :  { %v729_v27 = vperm.slane %v727_v48, 0  ;;  %v730_v35 = vperm.slane %v727_v48, 1  ;;  %s803_s26 = sshll.u32 %s1058_s9, 4  ;;  %s804_s26 = int_to_ptr.vmem [resolvable:$true] %s803_s26 }
 0x2c2   :  { %v683_v19 = vmul.f32 %v866_v22, %v675_v23  ;;  %v684_v29 = vmul.f32 %v866_v22, %v676_v25  ;;  %v685_v33 = vmul.f32 %v866_v22, %v677_v32  ;;  %v686_v34 = vmul.f32 %v866_v22, %v678_v26 }
 0x2c4   :  { %v691_v30 = vadd.f32 %v867_v24, %v683_v19  ;;  %v692_v31 = vadd.f32 %v867_v24, %v684_v29  ;;  %v693_v10 = vadd.f32 %v867_v24, %v685_v33  ;;  %v694_v63 = vadd.f32 %v867_v24, %v686_v34 }
 0x2c6   :  { %749 = vmatmul.f32.vlgmr.msrb.gmra.mxu0 %v691_v30  ;;  %781 = vmatmul.f32.vlgmr.msrb.gmra.mxu1 %v692_v31 }
 0x2ce   :  { %752 = vmatmul.f32.gmra.mxu0 %v692_v31  ;;  %784 = vmatmul.f32.gmra.mxu1 %v693_v10 }
 0x2d6   :  { %755 = vmatmul.f32.gmra.mxu0 %v693_v10  ;;  %787 = vmatmul.f32.gmra.mxu1 %v694_v63 }
 0x2de   :  { %758 = vmatmul.f32.gmra.mxu0 %v694_v63 }
 0x2e6   :  { %778 = vmatmul.f32.vlgmr.msra.gmra.mxu0 %v691_v30 }
 0x343   :  { %v750_v9 = vpop.f32.mrf.mxu0  ;;  %v782_v36 = vpop.f32.mrf.mxu1 }
 0x344   :  { %v751_v37 = vadd.f32 %v750_v9, %v729_v27  ;;  %v783_v38 = vadd.f32 %v782_v36, %v730_v35 }
 0x346   :  { %791 = vst [vmem:[#allocation13] sm:$0xff] %v751_v37 }
 0x347   :  { %794 = vst [vmem:[#allocation13 + $0x18] sm:$0xff] %v783_v38 }
 0x34b   :  { %v753_v28 = vpop.f32.mrf.mxu0  ;;  %v785_v39 = vpop.f32.mrf.mxu1 }
 0x34c   :  { %v754_v40 = vadd.f32 %v753_v28, %v729_v27  ;;  %v786_v41 = vadd.f32 %v785_v39, %v730_v35 }
 0x34e   :  { %793 = vst [vmem:[#allocation13 + $0x10] sm:$0xff] %v754_v40 }
 0x34f   :  { %796 = vst [vmem:[#allocation13 + $0x28] sm:$0xff] %v786_v41 }
 0x353   :  { %v756_v42 = vpop.f32.mrf.mxu0  ;;  %v788_v43 = vpop.f32.mrf.mxu1 }
 0x354   :  { %v757_v44 = vadd.f32 %v756_v42, %v729_v27  ;;  %v789_v45 = vadd.f32 %v788_v43, %v730_v35 }
 0x356   :  { %795 = vst [vmem:[#allocation13 + $0x20] sm:$0xff] %v757_v44 }
 0x357   :  { %798 = vst [vmem:[#allocation13 + $0x38] sm:$0xff] %v789_v45 }
 0x35b   :  { %v759_v46 = vpop.f32.mrf.mxu0 }
 0x35c   :  { %v760_v47 = vadd.f32 %v759_v46, %v729_v27 }
 0x35e   :  { %797 = vst [vmem:[#allocation13 + $0x30] sm:$0xff] %v760_v47 }
 0x363   :  { %v779_v49 = vpop.f32.mrf.mxu0 }
 0x364   :  { %v780_v50 = vadd.f32 %v779_v49, %v730_v35 }
 0x366   :  { %792 = vst [vmem:[#allocation13 + $0x8] sm:$0xff] %v780_v50 }
 0x367   :  { %811 = dma.vmem_to_hbm [thread:$0]  %s804_s26, 1024, %s806_s28, [#allocation4], %s1056_s20, %s1056_s20, %s1057_s23  }
 0x368   :  { %1046 = dma.done.wait [#allocation4], 1024  }
 0x369   :  { %1047 = vsyncadd [#allocation4], 4294966272 }
 0x36a   :  { %816 = vsyncpa [#allocation3], 1 }
 0x36b   :  { %817 = vsyncpa [#allocation6], 1 }
 0x36c   :  { %818 = vsyncpa [#allocation9], 1 }
 0x36d   :  { %819 = vsyncpa [#allocation12], 1 }
 0x36e   :  { %820 = vsyncpa [#allocation4], 1 }

</bundles_post_ra>
